<compile_context>
chip_gen: v7x
topology: tpu7x:2x2x1
jax: 0.10.0
libtpu: 0.0.40
codegen_flags: <defaults>
</compile_context>

<pallas_src>
import functools

import jax
import jax.numpy as jnp
from jax import lax
from jax.experimental import pallas as pl
from jax.experimental.pallas import tpu as pltpu


# ---------------------------------------------------------------------------
# Kernel
# ---------------------------------------------------------------------------

def _token_shift_kernel(x_ref, o_ref, *, c, n, ch_tile):
    """One (batch, channel-group) block: all S tokens, `ch_tile` channels.

    x_ref / o_ref: (1, S, W) with S = 1 + frames*n, W = ch_tile.
    Channel semantics (global channel q = g*ch_tile + lane):
      q in [0, c)   : frame-forward shift  (out[s] = x[s+n], zero at last frame)
      q in [c, 2c)  : identity
      q in [2c, 3c) : frame-backward shift (out[s] = x[s-n], zero at first frame)
      q in [3c, D)  : identity
    Token 0 (cls) passes through untouched in all channels.
    """
    g = pl.program_id(1)
    x = x_ref[...]
    s_total, w = x.shape[1], x.shape[2]

    # Frame shift by +-1 == token shift by +-n in the flattened (f n) layout.
    # Building the shifted views via concat with a zero frame also supplies the
    # zero fill of the boundary frame.  These are VMEM-local copies, hidden
    # under the HBM DMA (the kernel is bandwidth-bound).
    zeros_blk = jnp.zeros((1, n, w), x.dtype)
    fwd = jnp.concatenate([x[:, n:, :], zeros_blk], axis=1)            # fwd[s] = x[s+n]
    bwd = jnp.concatenate([zeros_blk, x[:, :s_total - n, :]], axis=1)  # bwd[s] = x[s-n]

    s_idx = lax.broadcasted_iota(jnp.int32, (1, s_total, 1), 1)
    ch = g * ch_tile + lax.broadcasted_iota(jnp.int32, (1, 1, w), 2)
    zero = jnp.zeros((), x.dtype)

    # Tokens 1..n (first frame) must be zero-filled for the backward chunk;
    # in particular token n must NOT read the cls token through bwd.
    bwd = jnp.where(s_idx >= n + 1, bwd, zero)

    ch_fwd = ch < c
    ch_bwd = jnp.logical_and(ch >= 2 * c, ch < 3 * c)
    shifted = jnp.where(ch_fwd, fwd, jnp.where(ch_bwd, bwd, x))
    # cls token (s == 0) passes through in all channels.
    o_ref[...] = jnp.where(s_idx == 0, x, shifted)


# ---------------------------------------------------------------------------
# Wrapper
# ---------------------------------------------------------------------------

def _choose_channel_tile(s, d, itemsize, target_bytes=2 << 20):
    """Channel-group width (last-dim block size).

    Must be a multiple of 128 (lane width) dividing d, or the full dim when d is
    not 128-aligned.  Prefer the largest width whose (S, W) block stays under
    ~2 MiB, and prefer >= 2 groups so the grid keeps a second parallel axis for
    megacore sharding even at batch == 1.
    """
    if d % 128 != 0:
        return d                            # full width: single group, still fused
    cands = [w for w in range(128, d + 1, 128) if d % w == 0]
    fitting = [w for w in cands if s * w * itemsize <= target_bytes] or [128]
    multi = [w for w in fitting if w <= d // 2]
    return max(multi) if multi else max(fitting)


def token_shift_pallas(x, frames, n):
    """x: (B, 1 + frames*n, D) -> same shape with the TimeSformer token shift."""
    b, s, d = x.shape
    c = d // 3
    ch_tile = _choose_channel_tile(s, d, x.dtype.itemsize)
    groups = d // ch_tile

    # Explicit VMEM budget: double-buffered in/out blocks + the two in-kernel
    # frame-shifted copies + headroom.  Capped at 64 MiB (v7x physical VMEM).
    block_bytes = s * ch_tile * x.dtype.itemsize
    vmem_limit = int(min(64 << 20, max(16 << 20, 12 * block_bytes + (2 << 20))))

    kernel = functools.partial(_token_shift_kernel, c=c, n=n, ch_tile=ch_tile)
    return pl.pallas_call(
        kernel,
        out_shape=jax.ShapeDtypeStruct((b, s, d), x.dtype),
        grid=(b, groups),
        in_specs=[pl.BlockSpec((1, s, ch_tile), lambda bi, g: (bi, 0, g))],
        out_specs=pl.BlockSpec((1, s, ch_tile), lambda bi, g: (bi, 0, g)),
        compiler_params=pltpu.CompilerParams(
            dimension_semantics=("parallel", "parallel"),
            vmem_limit_bytes=vmem_limit),
    )(x)


def pre_token_shift(x, frames, fn=lambda y: y):
    """JAX equivalent of PreTokenShift.forward.

    x: (batch, 1 + frames*n, dim).  `fn` is the wrapped module (identity here).
    """
    b, seq, d = x.shape
    assert d >= 3, "dim must be >= 3 for a non-empty dim//3 chunk"
    assert (seq - 1) % frames == 0, "seq-1 must be divisible by frames"
    n = (seq - 1) // frames
    return fn(token_shift_pallas(x, frames, n))


# ---------------------------------------------------------------------------
# Pure-JAX reference (mirrors the PyTorch forward) for verification
# ---------------------------------------------------------------------------

def _reference(x, frames):
    b, seq, d = x.shape
    flows_x, body = x[:, :1], x[:, 1:]
    n = (seq - 1) // frames
    x4 = body.reshape(b, frames, n, d)
    c = d // 3

    def shift(t, amt):
        if amt == 0:
            return t
        if amt > 0:   # F.pad(t, (0,0,0,0, amt,-amt)): pad front of frame axis
            return jnp.concatenate(
                [jnp.zeros_like(t[:, :amt]), t[:, :-amt]], axis=1)
        return jnp.concatenate(
            [t[:, -amt:], jnp.zeros_like(t[:, :(-amt)])], axis=1)

    chunks = [x4[..., i * c:(i + 1) * c] for i in range(3)]
    rest = x4[..., 3 * c:]
    shifted = [shift(chunks[0], -1), shift(chunks[1], 0), shift(chunks[2], 1)]
    x4 = jnp.concatenate(shifted + [rest], axis=-1)
    return jnp.concatenate([flows_x, x4.reshape(b, frames * n, d)], axis=1)


if __name__ == "__main__":
    key = jax.random.PRNGKey(0)
    configs = [
        # (B, frames, n, dim)
        (2, 4, 16, 32),    # dim not 128-aligned -> single full-width channel group
        (2, 3, 16, 384),   # c = 128 aligned, 3 channel groups
        (1, 4, 49, 256),   # n with no multiple-of-8 divisor (old fallback shape), B=1
        (2, 5, 28, 768),   # realistic dim (c = 256), n not a multiple of 8
    ]
    for idx, (B, FRAMES, N, D) in enumerate(configs):
        key, sub = jax.random.split(key)
        SEQ = 1 + FRAMES * N
        x = jax.random.normal(sub, (B, SEQ, D), dtype=jnp.float32)

        out = jax.block_until_ready(pre_token_shift(x, FRAMES))
        ref = _reference(x, FRAMES)

        assert out.shape == (B, SEQ, D)
        assert jnp.array_equal(out, ref), f"mismatch vs reference (config {idx})"
    print("KERNEL_OK")
</pallas_src>

<mosaic_0001>
module attributes {stable_mosaic.version = 11 : i64} {
  func.func @_token_shift_kernel(%arg0: i32, %arg1: i32, %arg2: memref<1x65x32xf32, #tpu.memory_space<vmem>>, %arg3: memref<1x65x32xf32, #tpu.memory_space<vmem>>) attributes {dimension_semantics = [#tpu.dimension_semantics<parallel>, #tpu.dimension_semantics<parallel>], iteration_bounds = array<i64: 2, 1>, scalar_prefetch = 0 : i64, scratch_operands = 0 : i64, tpu.core_type = #tpu.core_type<tc>, window_params = [{transform_indices = @transform_0, window_bounds = array<i64: 1, 65, 32>}, {transform_indices = @transform_1, window_bounds = array<i64: 1, 65, 32>}]} {
    %c0 = arith.constant 0 : index
    %c0_0 = arith.constant 0 : index
    %c0_1 = arith.constant 0 : index
    %0 = vector.load %arg2[%c0, %c0_0, %c0_1] : memref<1x65x32xf32, #tpu.memory_space<vmem>>, vector<1x65x32xf32>
    %cst = arith.constant 0.000000e+00 : f32
    %1 = vector.broadcast %cst : f32 to vector<1x16x32xf32>
    %2 = vector.extract_strided_slice %0 {offsets = [0, 16, 0], sizes = [1, 49, 32], strides = [1, 1, 1]} : vector<1x65x32xf32> to vector<1x49x32xf32>
    %3 = tpu.concatenate %2, %1 in 1 : vector<1x49x32xf32>, vector<1x16x32xf32> -> vector<1x65x32xf32>
    %4 = vector.extract_strided_slice %0 {offsets = [0, 0, 0], sizes = [1, 49, 32], strides = [1, 1, 1]} : vector<1x65x32xf32> to vector<1x49x32xf32>
    %5 = tpu.concatenate %1, %4 in 1 : vector<1x16x32xf32>, vector<1x49x32xf32> -> vector<1x65x32xf32>
    %6 = tpu.iota {dimensions = array<i32: 1>} : vector<1x65x1xi32>
    %c32_i32 = arith.constant 32 : i32
    %7 = arith.muli %arg1, %c32_i32 : i32
    %8 = tpu.iota {dimensions = array<i32: 2>} : vector<1x1x32xi32>
    %9 = vector.broadcast %7 : i32 to vector<1x1x32xi32>
    %10 = arith.addi %9, %8 : vector<1x1x32xi32>
    %c17_i32 = arith.constant 17 : i32
    %11 = vector.broadcast %c17_i32 : i32 to vector<1x65x1xi32>
    %12 = arith.cmpi sge, %6, %11 : vector<1x65x1xi32>
    %cst_2 = arith.constant 0.000000e+00 : f32
    %13 = vector.shape_cast %12 : vector<1x65x1xi1> to vector<1x65x1xi1>
    %14 = vector.broadcast %13 : vector<1x65x1xi1> to vector<1x65x32xi1>
    %15 = vector.broadcast %cst_2 : f32 to vector<1x65x32xf32>
    %16 = arith.select %14, %5, %15 : vector<1x65x32xi1>, vector<1x65x32xf32>
    %c10_i32 = arith.constant 10 : i32
    %17 = vector.broadcast %c10_i32 : i32 to vector<1x1x32xi32>
    %18 = arith.cmpi slt, %10, %17 : vector<1x1x32xi32>
    %c20_i32 = arith.constant 20 : i32
    %19 = vector.broadcast %c20_i32 : i32 to vector<1x1x32xi32>
    %20 = arith.cmpi sge, %10, %19 : vector<1x1x32xi32>
    %c30_i32 = arith.constant 30 : i32
    %21 = vector.broadcast %c30_i32 : i32 to vector<1x1x32xi32>
    %22 = arith.cmpi slt, %10, %21 : vector<1x1x32xi32>
    %23 = arith.andi %20, %22 : vector<1x1x32xi1>
    %24 = vector.shape_cast %23 : vector<1x1x32xi1> to vector<1x1x32xi1>
    %25 = vector.broadcast %24 : vector<1x1x32xi1> to vector<1x65x32xi1>
    %26 = arith.select %25, %16, %0 : vector<1x65x32xi1>, vector<1x65x32xf32>
    %27 = vector.shape_cast %18 : vector<1x1x32xi1> to vector<1x1x32xi1>
    %28 = vector.broadcast %27 : vector<1x1x32xi1> to vector<1x65x32xi1>
    %29 = arith.select %28, %3, %26 : vector<1x65x32xi1>, vector<1x65x32xf32>
    %c0_i32 = arith.constant 0 : i32
    %30 = vector.broadcast %c0_i32 : i32 to vector<1x65x1xi32>
    %31 = arith.cmpi eq, %6, %30 : vector<1x65x1xi32>
    %32 = vector.shape_cast %31 : vector<1x65x1xi1> to vector<1x65x1xi1>
    %33 = vector.broadcast %32 : vector<1x65x1xi1> to vector<1x65x32xi1>
    %34 = arith.select %33, %0, %29 : vector<1x65x32xi1>, vector<1x65x32xf32>
    %c0_3 = arith.constant 0 : index
    %c0_4 = arith.constant 0 : index
    %c0_5 = arith.constant 0 : index
    %35 = vector.load %arg3[%c0_3, %c0_4, %c0_5] : memref<1x65x32xf32, #tpu.memory_space<vmem>>, vector<1x65x32xf32>
    tpu.vector_store %arg3[%c0_3, %c0_4, %c0_5], %34 {strides = array<i32>} : memref<1x65x32xf32, #tpu.memory_space<vmem>>, vector<1x65x32xf32>,
    return
  }
  func.func @transform_0(%arg0: i32, %arg1: i32) -> (i32, i32, i32) {
    %c0_i32 = arith.constant 0 : i32
    %c0_i32_0 = arith.constant 0 : i32
    return %arg0, %c0_i32, %arg1 : i32, i32, i32
  }
  func.func @transform_1(%arg0: i32, %arg1: i32) -> (i32, i32, i32) {
    %c0_i32 = arith.constant 0 : i32
    %c0_i32_0 = arith.constant 0 : i32
    return %arg0, %c0_i32, %arg1 : i32, i32, i32
  }
}

</mosaic_0001>

<bundles_post_ra>
// kernel: tpu_custom_call.1
= control target key start
LH: loop header
LB: loop body
LE: loop exit
PB: predicated region body
PF: predicated region fallthrough
CT: control target
= control target key end

     0   :  { %s426_s6 = smov 0   ;;  %s428_s7 = smov 0   ;;  %s512_s0 = inlined_call_operand.vmem [shape: f32[2,65,32], index: 0, kind: input, shape index: {}]   ;;  %s513_s1 = inlined_call_operand.vmem [shape: f32[2,65,32], index: 1, kind: output, shape index: {}]  }
   0x1   :  { %s430_s8 = smov 0  }
   0x2 LB: > { %s23_s9 = sadd.s32 1, %s410_s7  ;;  %p362_p0 = scmp.ge.s32.totalorder %s414_s8, 1  ;;  %s414_s8 = sphi %s430_s8, %s11_s8   ;;  %s410_s7 = sphi %s428_s7, %s517_s7   ;;  %s406_s6 = sphi %s426_s6, %s516_s6  }
   0x3   : > { %p25_p1 = scmp.ge.s32.totalorder %s23_s9, 2  ;;  %p106_p2 = scmp.lt.s32.totalorder %s414_s8, 3 }
   0x5   : > { %s519_s9 = smov (%p25_p1, %s23_s9), 0  ;;  %p107_p3 = pnand %p362_p0, %p106_p2 }
   0x6   : > { %p132_p4 = scmp.lt.s32.totalorder (!%p107_p3), %s406_s6, 1  ;;  %v159_v0 = vlaneseq (!%p107_p3)  ;;  %vm264_vm4 = vcmask (!%p107_p3), 261120   ;;  %vm157_vm5 = vcmask (!%p107_p3), 1040384   ;;  %vm273_vm8 = vcmask (!%p107_p3), 253952  }
   0x7   : > { %110 = sbr.rel (%p107_p3) target bundleno = 27 (0x1b), region = 24 }
   0x8   : > { %v160_v1 = vshrl.u32 (!%p107_p3), %v159_v0, 7  ;;  %v171_v2 = vand.u32 (!%p107_p3), 127, %v159_v0 }
   0xa   : > { %vm203_vm0 = vcmp.ge.s32.totalorder (!%p107_p3), %v171_v2, 20  ;;  %vm204_vm1 = vcmp.lt.s32.totalorder (!%p107_p3), %v171_v2, 30  ;;  %v162_v4 = vadd.s32 (!%p107_p3), 16, %v160_v1  ;;  %vm202_vm3 = vcmp.lt.s32.totalorder (!%p107_p3), %v171_v2, 10 }
   0xb   : > { %vm444_vm2 = vmand (!%p107_p3), %vm203_vm0, %vm204_vm1  ;;  %vm228_vm6 = vcmp.eq.s32.totalorder (!%p107_p3), %v160_v1, 0 }
   0xc   : > { %vm174_vm7 = vcmp.ge.s32.totalorder (!%p107_p3), %v162_v4, 17 }
   0xe   : > { %s521_s6 = smov (!%p132_p4, %s406_s6), 1 }
   0xf   : > { %s367_s10 = smul.u32 72, %s521_s6 }
  0x11   : > { %s139_s13 = scalar_lea.vmem %s512_s0, %s367_s10  ;;  %s454_s16 = scalar_lea.vmem %s513_s1, %s367_s10 }
  0x12   : > { %v148_v5 = vld [vmem:[%s139_s13] sm:$0xff]  ;;  %v150_v6 = vld [vmem:[%s139_s13 + $0x10] sm:$0xff]  ;;  %v149_v7 = vld [vmem:[%s139_s13 + $0x8] sm:$0xff] }
  0x13   : > { %v208_v8 = vsel %vm444_vm2, 0.0, %v148_v5  ;;  %v151_v9 = vld [vmem:[%s139_s13 + $0x18] sm:$0xff]  ;;  %v209_v10 = vsel %vm444_vm2, 0.0, %v149_v7  ;;  %v152_v11 = vld [vmem:[%s139_s13 + $0x20] sm:$0xff]  ;;  %v195_v12 = vsel %vm174_vm7, %v148_v5, 0.0  ;;  %v153_v13 = vld [vmem:[%s139_s13 + $0x28] sm:$0xff] }
  0x14   : > { %v219_v14 = vsel %vm202_vm3, %v150_v6, %v208_v8  ;;  %v220_v15 = vsel %vm202_vm3, %v151_v9, %v209_v10  ;;  %v210_v16 = vsel %vm444_vm2, %v195_v12, %v150_v6  ;;  %v211_v17 = vsel %vm444_vm2, %v149_v7, %v151_v9  ;;  %v154_v18 = vld [vmem:[%s139_s13 + $0x30] sm:$0xff]  ;;  %v155_v19 = vld [vmem:[%s139_s13 + $0x38] sm:$0xff]  ;;  %v156_v20 = vld [vmem:[%s139_s13 + $0x40] sm:$0x1] }
  0x15   : > { %v255_v21 = vsel %vm228_vm6, %v148_v5, %v219_v14  ;;  %266 = vst.msk [vmem:[%s454_s16 + $0x8] sm:$0xff] %vm264_vm4, %v220_v15  ;;  %v221_v22 = vsel %vm202_vm3, %v152_v11, %v210_v16  ;;  %v222_v23 = vsel %vm202_vm3, %v153_v13, %v211_v17  ;;  %v212_v24 = vsel %vm444_vm2, %v150_v6, %v152_v11 }
  0x16   : > { %265 = vst.msk [vmem:[%s454_s16] sm:$0xff] %vm264_vm4, %v255_v21  ;;  %267 = vst.msk [vmem:[%s454_s16 + $0x10] sm:$0xff] %vm264_vm4, %v221_v22  ;;  %v223_v25 = vsel %vm202_vm3, %v154_v18, %v212_v24  ;;  %v213_v26 = vsel %vm444_vm2, %v151_v9, %v153_v13  ;;  %v158_v27 = vsel %vm157_vm5, %v156_v20, 0.0  ;;  %v214_v28 = vsel %vm444_vm2, %v152_v11, %v154_v18 }
  0x17   : > { %268 = vst.msk [vmem:[%s454_s16 + $0x18] sm:$0xff] %vm264_vm4, %v222_v23  ;;  %269 = vst.msk [vmem:[%s454_s16 + $0x20] sm:$0xff] %vm264_vm4, %v223_v25  ;;  %v224_v29 = vsel %vm202_vm3, %v155_v19, %v213_v26  ;;  %v225_v30 = vsel %vm202_vm3, %v158_v27, %v214_v28  ;;  %v215_v31 = vsel %vm444_vm2, %v153_v13, %v155_v19 }
  0x18   : > { %v216_v32 = vsel %vm444_vm2, %v154_v18, %v156_v20  ;;  %270 = vst.msk [vmem:[%s454_s16 + $0x28] sm:$0xff] %vm264_vm4, %v224_v29  ;;  %271 = vst.msk [vmem:[%s454_s16 + $0x30] sm:$0xff] %vm264_vm4, %v225_v30  ;;  %v226_v33 = vsel %vm202_vm3, 0.0, %v215_v31 }
  0x19   : > { %v227_v34 = vsel %vm202_vm3, 0.0, %v216_v32  ;;  %272 = vst.msk [vmem:[%s454_s16 + $0x38] sm:$0xff] %vm264_vm4, %v226_v33 }
  0x1a   : > { %274 = vst.msk [vmem:[%s454_s16 + $0x40] sm:$0x1] %vm273_vm8, %v227_v34 }
  0x1b PF: > { %s11_s8 = sadd.s32 1, %s414_s8   ;;  %s516_s6 = smov %s410_s7 }
  0x1c   : > { %p8_p5 = scmp.ge.s32.totalorder %s11_s8, 4   ;;  %s517_s7 = smov %s519_s9 }
  0x1e   :  { %10 = sbr.rel (!%p8_p5) target bundleno = 2 (0x2), region = 54 }

</bundles_post_ra>
